<compile_context>
chip_gen: v6e
topology: v6e:2x2x1
jax: 0.10.0
libtpu: 0.0.40
codegen_flags: <defaults>
</compile_context>

<pallas_src>
import functools
import math

import jax
import jax.numpy as jnp
import numpy as np
from jax.experimental import pallas as pl
from jax.experimental.pallas import tpu as pltpu


_TARGET_BLOCK_BYTES = 2 * 1024 * 1024   # ~2 MiB input block: near-HBM-roofline tile size
_VMEM_LIMIT_BYTES = 32 * 1024 * 1024    # explicit scoped-VMEM limit (>= v5e default of 16 MiB);
                                        # double-buffered in+out footprint is ~4x block ≈ 8 MiB,
                                        # safe on v5e/v6e (128 MiB) and v7x (64 MiB).


def _se3_norm_nl_kernel(x_ref, b_ref, o_ref, *, M, C, eps):
    """x_ref/o_ref: (2, tile_r, W) f32; b_ref: (1, W) f32 (bias pre-tiled per lane group)."""
    G = M * C              # lane-group size: one spatial point = M*C consecutive lanes
    l = (M - 1) // 2       # degree; M = 2l+1 (odd)
    W = x_ref.shape[-1]

    re = x_ref[0]          # (tile_r, W)
    im = x_ref[1]
    sq = re * re + im * im

    # Sum |z|^2 over the M m-slots of each lane group.  Shifts are symmetric around the
    # middle m slot, so at middle-slot lanes the result is the exact group sum regardless
    # of the rotation direction convention.  Exact f32 adds; XLU slot (free next to VPU).
    s = sq
    for j in range(1, l + 1):
        s = (s
             + pltpu.roll(sq, shift=j * C, axis=1)
             + pltpu.roll(sq, shift=W - j * C, axis=1))

    mag = jnp.sqrt(s) + eps                                  # valid at middle-slot lanes
    factor = jnp.maximum(mag + b_ref[...], 0.0) / mag        # ReLU(mag + b) / mag

    if l > 0:
        # Keep factor only at the middle m slot of each group, then broadcast it back to
        # all M slots with the same symmetric rolls (again direction-agnostic, exact).
        lane = jax.lax.broadcasted_iota(jnp.int32, factor.shape, 1)
        pos = lane % G
        anchor = (pos >= l * C) & (pos < (l + 1) * C)
        f0 = jnp.where(anchor, factor, 0.0)
        factor = f0
        for j in range(1, l + 1):
            factor = (factor
                      + pltpu.roll(f0, shift=j * C, axis=1)
                      + pltpu.roll(f0, shift=W - j * C, axis=1))

    o_ref[0] = re * factor
    o_ref[1] = im * factor


def _apply_part(x, b, *, eps=1e-5):
    """x: (2, *batch_spatial, M, C) float32 (leading axis = real/imag); b: (C,)."""
    x = x.astype(jnp.float32)
    b = b.astype(jnp.float32)
    orig_shape = x.shape
    M, C = int(orig_shape[-2]), int(orig_shape[-1])
    N = int(np.prod(orig_shape[1:-2]))
    G = M * C
    W = (G * 128) // math.gcd(G, 128)       # lcm(G, 128): lane-dense row width
    k = W // G                              # spatial points folded into one kernel row

    # Rows of the lane-dense 2D view; pad (zeros) so the grid tiles evenly (safe: zero
    # rows give mag = eps > 0 and zero outputs, which are sliced off afterwards).
    R = pl.cdiv(N, k)
    budget_rows = max(8, _TARGET_BLOCK_BYTES // (2 * W * 4))
    tile_r = R if budget_rows >= R else max(8, (budget_rows // 8) * 8)
    Rp = pl.cdiv(R, tile_r) * tile_r
    Np = Rp * k

    x2 = x.reshape(2, N, G)                 # free, contiguous reshape
    if Np != N:
        x2 = jnp.pad(x2, ((0, 0), (0, Np - N), (0, 0)))
    x2 = x2.reshape(2, Rp, W)               # free, contiguous reshape

    # Bias pre-tiled to the lane layout: value b[c] at every (m, c) slot of every group.
    b_full = jnp.tile(b, M * k).reshape(1, W)

    grid = (Rp // tile_r,)
    x_spec = pl.BlockSpec((2, tile_r, W), lambda i: (0, i, 0))
    b_spec = pl.BlockSpec((1, W), lambda i: (0, 0))

    out = pl.pallas_call(
        functools.partial(_se3_norm_nl_kernel, M=M, C=C, eps=eps),
        grid=grid,
        in_specs=[x_spec, b_spec],
        out_specs=x_spec,
        out_shape=jax.ShapeDtypeStruct((2, Rp, W), jnp.float32),
        compiler_params=pltpu.CompilerParams(
            dimension_semantics=("parallel",),   # row blocks are independent (v7x megacore)
            vmem_limit_bytes=_VMEM_LIMIT_BYTES,
        ),
    )(x2, b_full)

    out = out.reshape(2, Np, G)
    if Np != N:
        out = out[:, :N]
    return out.reshape(orig_shape)


def se3_norm_nonlinearity(parts, bs, *, eps=1e-5):
    """parts: list (per degree l) of float32 arrays (2, B, *spatial, 2l+1, C_l)
    (leading axis stacks real/imag of the complex SO3 part); bs: list of (C_l,) biases."""
    # TODO(synk): all degrees could additionally be fused into a single pallas_call via
    # scalar-prefetched per-degree offsets; kept as one lane-dense call per degree here.
    return [_apply_part(x, b, eps=eps) for x, b in zip(parts, bs)]


def _reference(parts, bs, eps=1e-5):
    outs = []
    for x, b in zip(parts, bs):
        re, im = x[0], x[1]
        mag = jnp.sqrt(jnp.sum(re * re + im * im, axis=-2, keepdims=True)) + eps
        factor = jax.nn.relu(mag + b) / mag
        outs.append(jnp.stack([re * factor, im * factor], axis=0))
    return outs


if __name__ == "__main__":
    key = jax.random.PRNGKey(0)

    # Module config: in_channels per degree l (l = 0, 1)
    in_channels = [4, 8]
    B, X, Y, Z = 2, 4, 4, 4

    keys = jax.random.split(key, 2 * len(in_channels))
    bs, parts = [], []
    for l, c in enumerate(in_channels):
        m = 2 * l + 1
        bs.append(jax.random.normal(keys[2 * l], (c,), dtype=jnp.float32))
        # Complex SO3vecArr part of shape (B, X, Y, Z, 2l+1, C), stored as stacked
        # (real, imag) float32 with a leading axis of size 2.
        parts.append(jax.random.normal(keys[2 * l + 1], (2, B, X, Y, Z, m, c),
                                       dtype=jnp.float32))

    outs = se3_norm_nonlinearity(parts, bs, eps=1e-5)
    outs = jax.block_until_ready(outs)

    refs = _reference(parts, bs, eps=1e-5)
    for o, r in zip(outs, refs):
        np.testing.assert_allclose(np.asarray(o), np.asarray(r), rtol=1e-5, atol=1e-5)

    print("KERNEL_OK")
</pallas_src>

<mosaic_0001>
module attributes {stable_mosaic.version = 11 : i64} {
  func.func @_se3_norm_nl_kernel(%arg0: i32, %arg1: memref<2x4x128xf32, #tpu.memory_space<vmem>>, %arg2: memref<1x128xf32, #tpu.memory_space<vmem>>, %arg3: memref<2x4x128xf32, #tpu.memory_space<vmem>>) attributes {dimension_semantics = [#tpu.dimension_semantics<parallel>], iteration_bounds = array<i64: 1>, scalar_prefetch = 0 : i64, scratch_operands = 0 : i64, tpu.core_type = #tpu.core_type<tc>, window_params = [{transform_indices = @transform_0, window_bounds = array<i64: 2, 4, 128>}, {pipeline_mode = #tpu.pipeline_mode<synchronous>, transform_indices = @transform_1, window_bounds = array<i64: 1, 128>}, {transform_indices = @transform_2, window_bounds = array<i64: 2, 4, 128>}]} {
    %c0 = arith.constant 0 : index
    %c0_0 = arith.constant 0 : index
    %c0_1 = arith.constant 0 : index
    %0 = vector.load %arg1[%c0, %c0_0, %c0_1] : memref<2x4x128xf32, #tpu.memory_space<vmem>>, vector<1x4x128xf32>
    %1 = vector.shape_cast %0 : vector<1x4x128xf32> to vector<4x128xf32>
    %c1 = arith.constant 1 : index
    %c0_2 = arith.constant 0 : index
    %c0_3 = arith.constant 0 : index
    %2 = vector.load %arg1[%c1, %c0_2, %c0_3] : memref<2x4x128xf32, #tpu.memory_space<vmem>>, vector<1x4x128xf32>
    %3 = vector.shape_cast %2 : vector<1x4x128xf32> to vector<4x128xf32>
    %4 = arith.mulf %1, %1 : vector<4x128xf32>
    %5 = arith.mulf %3, %3 : vector<4x128xf32>
    %6 = arith.addf %4, %5 : vector<4x128xf32>
    %7 = math.sqrt %6 : vector<4x128xf32>
    %cst = arith.constant 9.99999974E-6 : f32
    %8 = vector.broadcast %cst : f32 to vector<4x128xf32>
    %9 = arith.addf %7, %8 : vector<4x128xf32>
    %c0_4 = arith.constant 0 : index
    %c0_5 = arith.constant 0 : index
    %10 = vector.load %arg2[%c0_4, %c0_5] : memref<1x128xf32, #tpu.memory_space<vmem>>, vector<1x128xf32>
    %11 = vector.broadcast %10 : vector<1x128xf32> to vector<4x128xf32>
    %12 = arith.addf %9, %11 : vector<4x128xf32>
    %cst_6 = arith.constant 0.000000e+00 : f32
    %13 = vector.broadcast %cst_6 : f32 to vector<4x128xf32>
    %14 = arith.maximumf %12, %13 : vector<4x128xf32>
    %15 = arith.divf %14, %9 : vector<4x128xf32>
    %16 = arith.mulf %1, %15 : vector<4x128xf32>
    %c0_7 = arith.constant 0 : index
    %c0_8 = arith.constant 0 : index
    %c0_9 = arith.constant 0 : index
    %17 = vector.load %arg3[%c0_7, %c0_8, %c0_9] : memref<2x4x128xf32, #tpu.memory_space<vmem>>, vector<1x4x128xf32>
    %18 = vector.shape_cast %17 : vector<1x4x128xf32> to vector<4x128xf32>
    %19 = vector.shape_cast %16 : vector<4x128xf32> to vector<1x4x128xf32>
    tpu.vector_store %arg3[%c0_7, %c0_8, %c0_9], %19 {strides = array<i32>} : memref<2x4x128xf32, #tpu.memory_space<vmem>>, vector<1x4x128xf32>,
    %20 = arith.mulf %3, %15 : vector<4x128xf32>
    %c1_10 = arith.constant 1 : index
    %c0_11 = arith.constant 0 : index
    %c0_12 = arith.constant 0 : index
    %21 = vector.load %arg3[%c1_10, %c0_11, %c0_12] : memref<2x4x128xf32, #tpu.memory_space<vmem>>, vector<1x4x128xf32>
    %22 = vector.shape_cast %21 : vector<1x4x128xf32> to vector<4x128xf32>
    %23 = vector.shape_cast %20 : vector<4x128xf32> to vector<1x4x128xf32>
    tpu.vector_store %arg3[%c1_10, %c0_11, %c0_12], %23 {strides = array<i32>} : memref<2x4x128xf32, #tpu.memory_space<vmem>>, vector<1x4x128xf32>,
    return
  }
  func.func @transform_0(%arg0: i32) -> (i32, i32, i32) {
    %c0_i32 = arith.constant 0 : i32
    %c0_i32_0 = arith.constant 0 : i32
    %c0_i32_1 = arith.constant 0 : i32
    return %c0_i32, %arg0, %c0_i32_0 : i32, i32, i32
  }
  func.func @transform_1(%arg0: i32) -> (i32, i32) {
    %c0_i32 = arith.constant 0 : i32
    %c0_i32_0 = arith.constant 0 : i32
    %c0_i32_1 = arith.constant 0 : i32
    return %c0_i32, %c0_i32_0 : i32, i32
  }
  func.func @transform_2(%arg0: i32) -> (i32, i32, i32) {
    %c0_i32 = arith.constant 0 : i32
    %c0_i32_0 = arith.constant 0 : i32
    %c0_i32_1 = arith.constant 0 : i32
    return %c0_i32, %arg0, %c0_i32_0 : i32, i32, i32
  }
}

</mosaic_0001>

<bundles_post_ra>
// kernel: tpu_custom_call.1
= control target key start
LH: loop header
LB: loop body
LE: loop exit
PB: predicated region body
PF: predicated region fallthrough
CT: control target
= control target key end

     0   :  { %7 = vsyncpa [#allocation3], 0  ;;  %s160_s0 = inlined_call_operand.hbm [shape: f32[2,4,128], index: 0, kind: input, shape index: {}]   ;;  %s161_s1 = inlined_call_operand.vmem [shape: f32[1,128], index: 1, kind: input, shape index: {}]   ;;  %s162_s2 = inlined_call_operand.hbm [shape: f32[2,4,128], index: 2, kind: output, shape index: {}]  }
   0x1   :  { %8 = vsyncpa [#allocation4], 0  ;;  %s126_s9 = smov [#allocation2]  }
   0x2   :  { %s14_s10 = sshll.u32 %s126_s9, 4  ;;  %s15_s10 = int_to_ptr.vmem [resolvable:$true] %s14_s10 }
   0x3   :  { %s90_s11 = scalar_lea.vmem %s15_s10, 128  ;;  %p95_p1 = scmp.lt.s32.totalorder %s15_s10, %s15_s10 }
   0x4   :  { %p91_p0 = scmp.ne.s32.totalorder %s15_s10, %s90_s11  ;;  %p96_p2 = scmp.lt.s32.totalorder %s90_s11, %s90_s11 }
   0x6   :  { %p97_p3 = por %p96_p2, %p95_p1 }
   0x8   :  { %p98_p4 = pnand %p97_p3, %p91_p0 }
   0xa   :  { %101 = shalt.err (!%p98_p4)
}
   0xb   :  { %s127_s12 = smov 64   ;;  %s128_s13 = smov 4  }
   0xc   :  { %20 = dma.hbm_to_vmem [thread:$0]  %s160_s0, 128, %s15_s10, [#allocation3], %s127_s12, %s127_s12, %s128_s13  }
   0xd   :  { %122 = dma.done.wait [#allocation3], 128  }
   0xe   :  { %123 = vsyncadd [#allocation3], 4294967168  ;;  %v26_v0 = vld [vmem:[#allocation2] sm:$0xf]  ;;  %v28_v1 = vld [vmem:[#allocation2 + $0x4] sm:$0xf] }
   0xf   :  { %v29_v2 = vmul.f32 %v26_v0, %v26_v0  ;;  %v30_v3 = vmul.f32 %v28_v1, %v28_v1  ;;  %v73_v11 = vld [vmem:[%s161_s1] ss:$0 sm:$0xff]  ;;  %s129_s0 = smov [#allocation5]  }
  0x10   :  { %s61_s18 = sshll.u32 %s129_s0, 4  ;;  %s62_s18 = int_to_ptr.vmem [resolvable:$true] %s61_s18 }
  0x11   :  { %v31_v4 = vadd.f32 %v30_v3, %v29_v2  ;;  %s102_s19 = scalar_lea.vmem %s62_s18, 128  ;;  %p107_p6 = scmp.lt.s32.totalorder %s62_s18, %s62_s18 }
  0x12   :  { %p103_p5 = scmp.ne.s32.totalorder %s62_s18, %s102_s19  ;;  %p108_p7 = scmp.lt.s32.totalorder %s102_s19, %s102_s19 }
  0x13   :  { %78 = vrsqrt.f32 %v31_v4  ;;  %vm34_vm0 = vcmp.eq.f32.partialorder %v31_v4, inf  ;;  %v37_v6 = vand.u32 2147483648, %v31_v4  ;;  %vm36_vm1 = vcmp.eq.f32.partialorder %v31_v4, 0.0 }
  0x14   :  { %p109_p8 = por %p108_p7, %p107_p6 }
  0x16   :  { %p110_p9 = pnand %p109_p8, %p103_p5 }
  0x20   :  { %v79_v5 = vpop.eup %78 }
  0x21   :  { %v33_v7 = vmul.f32 %v79_v5, %v31_v4 }
  0x23   :  { %v35_v8 = vsel %vm34_vm0, %v31_v4, %v33_v7 }
  0x24   :  { %v38_v9 = vsel %vm36_vm1, %v37_v6, %v35_v8 }
  0x25   :  { %v39_v10 = vadd.f32 1e-05, %v38_v9 }
  0x27   :  { %80 = vrcp.f32 %v39_v10  ;;  %v47_v12 = vadd.f32 %v73_v11, %v39_v10 }
  0x29   :  { %v48_v13 = vmax.f32 %v47_v12, 0.0 }
  0x34   :  { %v81_v14 = vpop.eup %80 }
  0x35   :  { %v50_v15 = vmul.f32 %v81_v14, %v48_v13 }
  0x37   :  { %v51_v16 = vmul.f32 %v50_v15, %v26_v0  ;;  %v53_v17 = vmul.f32 %v50_v15, %v28_v1 }
  0x39   :  { %52 = vst [vmem:[#allocation5] sm:$0xf] %v51_v16  ;;  %55 = vst [vmem:[#allocation5 + $0x4] sm:$0xf] %v53_v17 }
  0x3a   :  { %113 = shalt.err (!%p110_p9)
}
  0x3b   :  { %67 = dma.vmem_to_hbm [thread:$0]  %s62_s18, 128, %s162_s2, [#allocation4], %s127_s12, %s127_s12, %s128_s13  }
  0x3c   :  { %124 = dma.done.wait [#allocation4], 128  }
  0x3d   :  { %125 = vsyncadd [#allocation4], 4294967168 }
  0x3e   :  { %71 = vsyncpa [#allocation3], 1 }
  0x3f   :  { %72 = vsyncpa [#allocation4], 1 }

</bundles_post_ra>
